<compile_context>
chip_gen: v7x
topology: tpu7x:2x2x1
jax: 0.10.0
libtpu: 0.0.40
codegen_flags: <defaults>
</compile_context>

<pallas_src>
import jax
import jax.numpy as jnp
from jax.experimental import pallas as pl
from jax.experimental.pallas import tpu as pltpu


# ----------------------------------------------------------------------------
# Generation-aware VMEM helpers
# ----------------------------------------------------------------------------
def _tpu_vmem_capacity():
    """Physical per-core VMEM in bytes (64 MiB v7x-safe fallback)."""
    try:
        return int(pltpu.get_tpu_info().vmem_capacity_bytes)
    except Exception:
        return 64 * 1024 * 1024


def _vmem_limit(needed_bytes, cap):
    """Per-call vmem_limit_bytes computed from actual block/scratch bytes."""
    limit = int(needed_bytes) + 4 * 1024 * 1024      # headroom for spills/layout
    limit = max(limit, 16 * 1024 * 1024)             # above v5e scoped default
    return int(min(limit, int(cap * 0.8)))           # stay off the physical cap


def _pick_hw_tile(hw, c, cap, itemsize):
    """Largest multiple-of-128 divisor of HW whose double-buffered x tile fits
    a generation-dependent budget (~16 MiB on v7x, ~32 MiB on v5e/v6e)."""
    budget = (16 if cap <= 64 * 1024 * 1024 else 32) * 1024 * 1024
    best = None
    t = 128
    while t <= hw:
        if hw % t == 0 and 2 * c * t * itemsize <= budget:
            best = t
        t += 128
    return best if best is not None else hw   # full axis is always layout-legal


# ----------------------------------------------------------------------------
# Kernel 1: ChannelAttention  ->  ca (B, C) in [0, 1]
# ----------------------------------------------------------------------------
def channel_attention(x, w1, w2, *, hw_tile=None, vmem_cap=None):
    """x: (B, C, H, W); w1: (Cr, C); w2: (C, Cr).  Returns (B, C) float32."""
    B, C, H, W = x.shape
    Cr = w1.shape[0]
    HW = H * W
    x3 = x.reshape(B, C, HW)
    itemsize = x.dtype.itemsize

    if vmem_cap is None:
        vmem_cap = _tpu_vmem_capacity()
    if hw_tile is None:
        hw_tile = _pick_hw_tile(HW, C, vmem_cap, itemsize)
    assert HW % hw_tile == 0, (HW, hw_tile)
    k_steps = HW // hw_tile

    # Pre-transpose in the wrapper so the kernel never does an XLU transpose.
    w1_t = w1.T.astype(jnp.float32)   # (C, Cr)
    w2_t = w2.T.astype(jnp.float32)   # (Cr, C)
    inv_hw = 1.0 / float(HW)

    def kernel(x_ref, w1t_ref, w2t_ref, o_ref, sum_ref, max_ref):
        k = pl.program_id(1)

        @pl.when(k == 0)
        def _init():
            sum_ref[...] = jnp.zeros_like(sum_ref)
            max_ref[...] = jnp.full_like(max_ref, -jnp.inf)

        tile = x_ref[...].astype(jnp.float32)              # (1, C, hw_tile)
        sum_ref[...] += jnp.sum(tile, axis=-1)             # running sum
        max_ref[...] = jnp.maximum(max_ref[...], jnp.max(tile, axis=-1))

        @pl.when(k == pl.num_programs(1) - 1)
        def _finalize():
            avg = sum_ref[...] * inv_hw                    # single 1/HW multiply
            pooled = jnp.concatenate([avg, max_ref[...]], axis=0)       # (2, C)
            hid = jnp.maximum(
                jnp.dot(pooled, w1t_ref[...],
                        preferred_element_type=jnp.float32), 0.0)       # (2, Cr)
            both = jnp.dot(hid, w2t_ref[...],
                           preferred_element_type=jnp.float32)          # (2, C)
            att = jax.nn.sigmoid(both[0:1, :] + both[1:2, :])           # (1, C)
            o_ref[...] = att[:, None, :].astype(o_ref.dtype)            # (1,1,C)

    needed = (2 * C * hw_tile * itemsize        # x tile (double-buffered)
              + 2 * C * hw_tile * 4             # f32 working copy
              + 4 * C * Cr * 4                  # both weight blocks (dbl-buf)
              + 2 * C * 4                       # output block (dbl-buf)
              + 2 * 2 * C * 4)                  # sum/max scratch
    cost = pl.CostEstimate(
        flops=int(2 * B * C * HW + 8 * B * C * Cr),
        transcendentals=int(B * C),
        bytes_accessed=int(itemsize * B * C * HW + 4 * (2 * C * Cr + B * C)),
    )

    out = pl.pallas_call(
        kernel,
        out_shape=jax.ShapeDtypeStruct((B, 1, C), jnp.float32),
        grid=(B, k_steps),
        in_specs=[
            pl.BlockSpec((1, C, hw_tile), lambda b, k: (b, 0, k)),
            pl.BlockSpec((C, Cr), lambda b, k: (0, 0)),
            pl.BlockSpec((Cr, C), lambda b, k: (0, 0)),
        ],
        out_specs=pl.BlockSpec((1, 1, C), lambda b, k: (b, 0, 0)),
        scratch_shapes=[
            pltpu.VMEM((1, C), jnp.float32),   # running sum
            pltpu.VMEM((1, C), jnp.float32),   # running max
        ],
        compiler_params=pltpu.CompilerParams(
            dimension_semantics=("parallel", "arbitrary"),
            vmem_limit_bytes=_vmem_limit(needed, vmem_cap),
        ),
        cost_estimate=cost,
    )(x3, w1_t, w2_t)

    return out.reshape(B, C)


# ----------------------------------------------------------------------------
# Kernel 2 (fused): out1 = x*ca; channel-pool into an in-kernel padded scratch;
# 7x7 conv + sigmoid; apply.  One HBM read of x, one HBM write of the output.
# ----------------------------------------------------------------------------
def _spatial_attention_apply(x, ca_w, w_sa, *, vmem_cap=None):
    B, C, H, W = x.shape
    ksz = w_sa.shape[-1]
    pad = (ksz - 1) // 2
    Hp = H + 2 * pad
    # Lane-align the padded pooled scratch (last dim a multiple of 128).
    Wp_pad = max(((W + 2 * pad + 127) // 128) * 128, 128)
    itemsize = x.dtype.itemsize
    inv_c = 1.0 / float(C)

    if vmem_cap is None:
        vmem_cap = _tpu_vmem_capacity()

    # Reorder conv weights to (c, dx, dy) so the in-kernel SMEM index is
    # simply slab_index * ksz + dy.
    w_sa_r = jnp.transpose(w_sa[0], (0, 2, 1)).reshape(-1).astype(jnp.float32)

    def kernel(x_ref, ca_ref, wsa_ref, o_ref, pp_ref, slabs_ref):
        xv = x_ref[...].astype(jnp.float32)                 # (1, C, H, W)
        cav = ca_ref[...].astype(jnp.float32)               # (1, C, 1, W)
        out1 = xv * cav                                     # sublane bcast 1->H

        # Channel pooling: reduction over the non-tiled C axis -> pure VPU.
        avg_c = jnp.sum(out1, axis=1) * inv_c               # (1, H, W)
        max_c = jnp.max(out1, axis=1)                       # (1, H, W)

        # Zero-padded pooled map lives entirely in VMEM scratch.
        pp_ref[...] = jnp.zeros_like(pp_ref)
        pp_ref[0, pad:pad + H, pad:pad + W] = avg_c[0]
        pp_ref[1, pad:pad + H, pad:pad + W] = max_c[0]

        # Hoisted lane (dx) shifts: 2*ksz shifted slabs built once, one lane
        # shift each (instead of one per (dy, dx) tap).
        for c in range(2):
            for dx in range(ksz):
                slabs_ref[c * ksz + dx, :, :] = pp_ref[c, :, dx:dx + W]

        # Bounded live ranges: fori_loop over the slabs, only the ksz sublane
        # (dy) slices unrolled inside; weights read from SMEM by dynamic index.
        def conv_step(i, acc):
            slab = slabs_ref[i]                              # (Hp, W)
            for dy in range(ksz):
                acc = acc + wsa_ref[i * ksz + dy] * slab[dy:dy + H, :]
            return acc

        acc = jax.lax.fori_loop(0, 2 * ksz, conv_step,
                                jnp.zeros((H, W), jnp.float32))
        sa = jax.nn.sigmoid(acc)                             # (H, W)
        o_ref[...] = (out1 * sa[None, None, :, :]).astype(o_ref.dtype)

    needed = (2 * C * H * W * itemsize          # x block (double-buffered)
              + 2 * C * H * W * itemsize        # output block (double-buffered)
              + 2 * C * H * W * 4               # f32 working copy of out1
              + 2 * C * W * 4                   # ca block
              + 2 * Hp * Wp_pad * 4             # padded pooled scratch
              + 2 * ksz * Hp * W * 4)           # hoisted dx slabs scratch
    cost = pl.CostEstimate(
        flops=int(B * H * W * (4 * C + 4 * ksz * ksz)),
        transcendentals=int(B * H * W),
        bytes_accessed=int(2 * itemsize * B * C * H * W + 4 * B * C * W
                           + 4 * 2 * ksz * ksz),
    )

    return pl.pallas_call(
        kernel,
        out_shape=jax.ShapeDtypeStruct((B, C, H, W), x.dtype),
        grid=(B,),
        in_specs=[
            pl.BlockSpec((1, C, H, W), lambda b: (b, 0, 0, 0)),
            pl.BlockSpec((1, C, 1, W), lambda b: (b, 0, 0, 0)),
            pl.BlockSpec(memory_space=pltpu.MemorySpace.SMEM),   # conv weights
        ],
        out_specs=pl.BlockSpec((1, C, H, W), lambda b: (b, 0, 0, 0)),
        scratch_shapes=[
            pltpu.VMEM((2, Hp, Wp_pad), jnp.float32),            # padded pooled
            pltpu.VMEM((2 * ksz, Hp, W), jnp.float32),           # dx slabs
        ],
        compiler_params=pltpu.CompilerParams(
            dimension_semantics=("parallel",),
            vmem_limit_bytes=_vmem_limit(needed, vmem_cap),
        ),
        cost_estimate=cost,
    )(x, ca_w, w_sa_r)


# ----------------------------------------------------------------------------
# Full CBAM forward
# ----------------------------------------------------------------------------
def cbam_forward(x, w1, w2, w_sa, *, hw_tile=None):
    """x: (B,C,H,W); w1: (Cr,C); w2: (C,Cr); w_sa: (1,2,k,k) -> (B,C,H,W)."""
    B, C, H, W = x.shape
    cap = _tpu_vmem_capacity()
    ca = channel_attention(x, w1, w2, hw_tile=hw_tile, vmem_cap=cap)   # (B, C)
    # Pre-broadcast along W so the in-kernel multiply is a plain sublane
    # broadcast (1 -> H); tiny (B*C*W) helper tensor.
    ca_w = jnp.broadcast_to(ca[:, :, None, None], (B, C, 1, W))
    return _spatial_attention_apply(x, ca_w, w_sa, vmem_cap=cap)


# ----------------------------------------------------------------------------
# Pure-JAX reference matching the PyTorch CBAM forward
# ----------------------------------------------------------------------------
def cbam_ref(x, w1, w2, w_sa):
    hp = jax.lax.Precision.HIGHEST
    avg = jnp.mean(x, axis=(2, 3))
    mx = jnp.max(x, axis=(2, 3))
    a = jnp.dot(jnp.maximum(jnp.dot(avg, w1.T, precision=hp), 0.0), w2.T, precision=hp)
    m = jnp.dot(jnp.maximum(jnp.dot(mx, w1.T, precision=hp), 0.0), w2.T, precision=hp)
    ca = jax.nn.sigmoid(a + m)[:, :, None, None]
    out1 = x * ca

    avg_c = jnp.mean(out1, axis=1, keepdims=True)
    max_c = jnp.max(out1, axis=1, keepdims=True)
    cat = jnp.concatenate([avg_c, max_c], axis=1)
    pad = (w_sa.shape[-1] - 1) // 2
    sa = jax.lax.conv_general_dilated(
        cat, w_sa, window_strides=(1, 1), padding=((pad, pad), (pad, pad)),
        dimension_numbers=("NCHW", "OIHW", "NCHW"), precision=hp)
    return out1 * jax.nn.sigmoid(sa)


if __name__ == "__main__":
    B, C, H, W = 2, 32, 16, 16
    ratio = 4
    Cr = C // ratio
    ksize = 7

    key = jax.random.PRNGKey(0)
    kx, k1, k2, k3 = jax.random.split(key, 4)
    x = jax.random.normal(kx, (B, C, H, W), dtype=jnp.float32)
    # Conv2d(.., kernel_size=1, bias=False) weights with 1x1 spatial squeezed.
    w1 = jax.random.normal(k1, (Cr, C), dtype=jnp.float32) * (1.0 / jnp.sqrt(C))
    w2 = jax.random.normal(k2, (C, Cr), dtype=jnp.float32) * (1.0 / jnp.sqrt(Cr))
    # SpatialAttention Conv2d(2, 1, 7, padding=3, bias=False) weight.
    w_sa = jax.random.normal(k3, (1, 2, ksize, ksize), dtype=jnp.float32) * 0.1

    # hw_tile=128 forces a 2-step spatial reduction so the accumulator /
    # init / finalize path is actually exercised at this small shape.
    out = jax.block_until_ready(cbam_forward(x, w1, w2, w_sa, hw_tile=128))
    ref = jax.block_until_ready(cbam_ref(x, w1, w2, w_sa))

    assert out.shape == (B, C, H, W), out.shape
    err = float(jnp.max(jnp.abs(out - ref)))
    assert err < 1e-3, err
    print("KERNEL_OK")
</pallas_src>

<mosaic_0001>
module attributes {stable_mosaic.version = 11 : i64} {
  func.func @kernel(%arg0: i32, %arg1: i32, %arg2: memref<1x32x128xf32, #tpu.memory_space<vmem>>, %arg3: memref<32x8xf32, #tpu.memory_space<vmem>>, %arg4: memref<8x32xf32, #tpu.memory_space<vmem>>, %arg5: memref<1x1x32xf32, #tpu.memory_space<vmem>>, %arg6: memref<1x32xf32, #tpu.memory_space<vmem>>, %arg7: memref<1x32xf32, #tpu.memory_space<vmem>>) attributes {dimension_semantics = [#tpu.dimension_semantics<parallel>, #tpu.dimension_semantics<arbitrary>], iteration_bounds = array<i64: 2, 2>, scalar_prefetch = 0 : i64, scratch_operands = 2 : i64, tpu.core_type = #tpu.core_type<tc>, window_params = [{transform_indices = @transform_0, window_bounds = array<i64: 1, 32, 128>}, {pipeline_mode = #tpu.pipeline_mode<synchronous>, transform_indices = @transform_1, window_bounds = array<i64: 32, 8>}, {pipeline_mode = #tpu.pipeline_mode<synchronous>, transform_indices = @transform_2, window_bounds = array<i64: 8, 32>}, {transform_indices = @transform_3, window_bounds = array<i64: 1, 1, 32>}]} {
    %c0_i32 = arith.constant 0 : i32
    %0 = arith.cmpi eq, %arg1, %c0_i32 : i32
    %1 = arith.extui %0 : i1 to i32
    %c0_i32_0 = arith.constant 0 : i32
    %2 = arith.cmpi ne, %1, %c0_i32_0 : i32
    scf.if %2 {
      %cst_13 = arith.constant 0.000000e+00 : f32
      %15 = vector.broadcast %cst_13 : f32 to vector<1x32xf32>
      %c0_14 = arith.constant 0 : index
      %c0_15 = arith.constant 0 : index
      %16 = vector.load %arg6[%c0_14, %c0_15] : memref<1x32xf32, #tpu.memory_space<vmem>>, vector<1x32xf32>
      tpu.vector_store %arg6[%c0_14, %c0_15], %15 {strides = array<i32>} : memref<1x32xf32, #tpu.memory_space<vmem>>, vector<1x32xf32>,
      %cst_16 = arith.constant 0xFF800000 : f32
      %17 = vector.broadcast %cst_16 : f32 to vector<1x32xf32>
      %c0_17 = arith.constant 0 : index
      %c0_18 = arith.constant 0 : index
      %18 = vector.load %arg7[%c0_17, %c0_18] : memref<1x32xf32, #tpu.memory_space<vmem>>, vector<1x32xf32>
      tpu.vector_store %arg7[%c0_17, %c0_18], %17 {strides = array<i32>} : memref<1x32xf32, #tpu.memory_space<vmem>>, vector<1x32xf32>,
    } else {
    }
    %c0 = arith.constant 0 : index
    %c0_1 = arith.constant 0 : index
    %c0_2 = arith.constant 0 : index
    %3 = vector.load %arg2[%c0, %c0_1, %c0_2] : memref<1x32x128xf32, #tpu.memory_space<vmem>>, vector<1x32x128xf32>
    %c0_3 = arith.constant 0 : index
    %c0_4 = arith.constant 0 : index
    %4 = vector.load %arg6[%c0_3, %c0_4] : memref<1x32xf32, #tpu.memory_space<vmem>>, vector<1x32xf32>
    %cst = arith.constant dense<0.000000e+00> : vector<1x32xf32>
    %5 = vector.multi_reduction <add>, %3, %cst [2] : vector<1x32x128xf32> to vector<1x32xf32>
    %6 = arith.addf %4, %5 : vector<1x32xf32>
    %c0_5 = arith.constant 0 : index
    %c0_6 = arith.constant 0 : index
    %7 = vector.load %arg6[%c0_5, %c0_6] : memref<1x32xf32, #tpu.memory_space<vmem>>, vector<1x32xf32>
    tpu.vector_store %arg6[%c0_5, %c0_6], %6 {strides = array<i32>} : memref<1x32xf32, #tpu.memory_space<vmem>>, vector<1x32xf32>,
    %c0_7 = arith.constant 0 : index
    %c0_8 = arith.constant 0 : index
    %8 = vector.load %arg7[%c0_7, %c0_8] : memref<1x32xf32, #tpu.memory_space<vmem>>, vector<1x32xf32>
    %cst_9 = arith.constant dense<0xFF800000> : vector<1x32xf32>
    %9 = vector.multi_reduction <maximumf>, %3, %cst_9 [2] : vector<1x32x128xf32> to vector<1x32xf32>
    %10 = arith.maximumf %8, %9 : vector<1x32xf32>
    %c0_10 = arith.constant 0 : index
    %c0_11 = arith.constant 0 : index
    %11 = vector.load %arg7[%c0_10, %c0_11] : memref<1x32xf32, #tpu.memory_space<vmem>>, vector<1x32xf32>
    tpu.vector_store %arg7[%c0_10, %c0_11], %10 {strides = array<i32>} : memref<1x32xf32, #tpu.memory_space<vmem>>, vector<1x32xf32>,
    %c1_i32 = arith.constant 1 : i32
    %12 = arith.cmpi eq, %arg1, %c1_i32 : i32
    %13 = arith.extui %12 : i1 to i32
    %c0_i32_12 = arith.constant 0 : i32
    %14 = arith.cmpi ne, %13, %c0_i32_12 : i32
    scf.if %14 {
      %c0_13 = arith.constant 0 : index
      %c0_14 = arith.constant 0 : index
      %15 = vector.load %arg6[%c0_13, %c0_14] : memref<1x32xf32, #tpu.memory_space<vmem>>, vector<1x32xf32>
      %cst_15 = arith.constant 3.906250e-03 : f32
      %16 = vector.broadcast %cst_15 : f32 to vector<1x32xf32>
      %17 = arith.mulf %15, %16 : vector<1x32xf32>
      %c0_16 = arith.constant 0 : index
      %c0_17 = arith.constant 0 : index
      %18 = vector.load %arg7[%c0_16, %c0_17] : memref<1x32xf32, #tpu.memory_space<vmem>>, vector<1x32xf32>
      %19 = tpu.concatenate %17, %18 in 0 : vector<1x32xf32>, vector<1x32xf32> -> vector<2x32xf32>
      %c0_18 = arith.constant 0 : index
      %c0_19 = arith.constant 0 : index
      %20 = vector.load %arg3[%c0_18, %c0_19] : memref<32x8xf32, #tpu.memory_space<vmem>>, vector<32x8xf32>
      %cst_20 = arith.constant dense<0.000000e+00> : vector<2x8xf32>
      %21 = tpu.matmul %19, %20, %cst_20 {dimension_numbers = #tpu.dot_dimension_numbers<[1], [0], [0], [1], [0, 0, 1, 1], [], []>} : vector<2x32xf32>, vector<32x8xf32>, vector<2x8xf32> -> vector<2x8xf32>
      %cst_21 = arith.constant 0.000000e+00 : f32
      %22 = vector.broadcast %cst_21 : f32 to vector<2x8xf32>
      %23 = arith.maximumf %21, %22 : vector<2x8xf32>
      %c0_22 = arith.constant 0 : index
      %c0_23 = arith.constant 0 : index
      %24 = vector.load %arg4[%c0_22, %c0_23] : memref<8x32xf32, #tpu.memory_space<vmem>>, vector<8x32xf32>
      %cst_24 = arith.constant dense<0.000000e+00> : vector<2x32xf32>
      %25 = tpu.matmul %23, %24, %cst_24 {dimension_numbers = #tpu.dot_dimension_numbers<[1], [0], [0], [1], [0, 0, 1, 1], [], []>} : vector<2x8xf32>, vector<8x32xf32>, vector<2x32xf32> -> vector<2x32xf32>
      %26 = vector.extract_strided_slice %25 {offsets = [0, 0], sizes = [1, 32], strides = [1, 1]} : vector<2x32xf32> to vector<1x32xf32>
      %27 = vector.extract_strided_slice %25 {offsets = [1, 0], sizes = [1, 32], strides = [1, 1]} : vector<2x32xf32> to vector<1x32xf32>
      %28 = arith.addf %26, %27 : vector<1x32xf32>
      %29 = arith.negf %28 : vector<1x32xf32>
      %30 = math.exp %29 : vector<1x32xf32>
      %cst_25 = arith.constant 1.000000e+00 : f32
      %31 = vector.broadcast %cst_25 : f32 to vector<1x32xf32>
      %32 = arith.addf %31, %30 : vector<1x32xf32>
      %33 = arith.divf %31, %32 : vector<1x32xf32>
      %34 = vector.shape_cast %33 : vector<1x32xf32> to vector<1x1x32xf32>
      %c0_26 = arith.constant 0 : index
      %c0_27 = arith.constant 0 : index
      %c0_28 = arith.constant 0 : index
      %35 = vector.load %arg5[%c0_26, %c0_27, %c0_28] : memref<1x1x32xf32, #tpu.memory_space<vmem>>, vector<1x1x32xf32>
      tpu.vector_store %arg5[%c0_26, %c0_27, %c0_28], %34 {strides = array<i32>} : memref<1x1x32xf32, #tpu.memory_space<vmem>>, vector<1x1x32xf32>,
    } else {
    }
    return
  }
  func.func @transform_0(%arg0: i32, %arg1: i32) -> (i32, i32, i32) {
    %c0_i32 = arith.constant 0 : i32
    %c0_i32_0 = arith.constant 0 : i32
    return %arg0, %c0_i32, %arg1 : i32, i32, i32
  }
  func.func @transform_1(%arg0: i32, %arg1: i32) -> (i32, i32) {
    %c0_i32 = arith.constant 0 : i32
    %c0_i32_0 = arith.constant 0 : i32
    %c0_i32_1 = arith.constant 0 : i32
    return %c0_i32, %c0_i32_0 : i32, i32
  }
  func.func @transform_2(%arg0: i32, %arg1: i32) -> (i32, i32) {
    %c0_i32 = arith.constant 0 : i32
    %c0_i32_0 = arith.constant 0 : i32
    %c0_i32_1 = arith.constant 0 : i32
    return %c0_i32, %c0_i32_0 : i32, i32
  }
  func.func @transform_3(%arg0: i32, %arg1: i32) -> (i32, i32, i32) {
    %c0_i32 = arith.constant 0 : i32
    %c0_i32_0 = arith.constant 0 : i32
    %c0_i32_1 = arith.constant 0 : i32
    return %arg0, %c0_i32, %c0_i32_0 : i32, i32, i32
  }
}

</mosaic_0001>

<bundles_post_ra>
// kernel: tpu_custom_call.1
= control target key start
LH: loop header
LB: loop body
LE: loop exit
PB: predicated region body
PF: predicated region fallthrough
CT: control target
= control target key end

     0   :  { %8 = vsyncpa [#allocation5], 0  ;;  %s2012_s0 = inlined_call_operand.hbm [shape: f32[2,32,256], index: 0, kind: input, shape index: {}]   ;;  %s2013_s1 = inlined_call_operand.vmem [shape: f32[32,8], index: 1, kind: input, shape index: {}]   ;;  %s2014_s2 = inlined_call_operand.vmem [shape: f32[8,32], index: 2, kind: input, shape index: {}]   ;;  %s2015_s3 = inlined_call_operand.hbm [shape: f32[2,1,32], index: 3, kind: output, shape index: {}]  }
   0x1   :  { %10 = vsyncpa [#allocation5 + $0x1], 0 }
   0x2   :  { %11 = vsyncpa [#allocation6], 0 }
   0x3   :  { %13 = vsyncpa [#allocation6 + $0x1], 0  ;;  %s1616_s12 = smov 0   ;;  %s1618_s13 = smov 0  }
   0x4   :  { %s1620_s14 = smov 0   ;;  %s1622_s15 = smov 0  }
   0x5   :  { %s1624_s16 = smov 0   ;;  %s1626_s17 = smov 0  }
   0x6   :  { %s1628_s18 = smov 0   ;;  %s1630_s19 = smov 0  }
   0x7   :  { %s1632_s20 = smov 0   ;;  %s1634_s21 = smov 0  }
   0x8   :  { %s1636_s22 = smov 0  }
   0x9 LB: > { %s1265_s23 = sadd.s32 4294967295, %s1582_s22   ;;  %s1266_s24 = sadd.s32 4294967294, %s1582_s22   ;;  %s1582_s22 = sphi %s1636_s22, %s19_s22   ;;  %s1578_s21 = sphi %s1634_s21, %s2039_s21   ;;  %s1574_s20 = sphi %s1632_s20, %s2038_s20   ;;  %s1570_s19 = sphi %s1630_s19, %s2037_s19   ;;  %s1566_s18 = sphi %s1628_s18, %s2036_s18   ;;  %s1562_s17 = sphi %s1626_s17, %s2035_s17   ;;  %s1558_s16 = sphi %s1624_s16, %s2034_s16   ;;  %s1554_s15 = sphi %s1622_s15, %s2033_s15   ;;  %s1550_s14 = sphi %s1620_s14, %s2032_s14   ;;  %s1546_s13 = sphi %s1618_s13, %s2031_s13   ;;  %s1542_s12 = sphi %s1616_s12, %s2030_s12  }
   0xa   : > { %s28_s25 = sadd.s32 1, %s1574_s20  ;;  %s31_s26 = sadd.s32 1, %s1578_s21 }
   0xb   : > { %p29_p0 = scmp.ge.s32.totalorder %s28_s25, 2  ;;  %s40_s27 = sadd.s32 1, %s1562_s17 }
   0xc   : > { %p47_p1 = scmp.ne.s32.totalorder %s1562_s17, %s1558_s16  ;;  %p48_p2 = scmp.eq.s32.totalorder %s1582_s22, 0 }
   0xd   : > { %s2041_s25 = smov (%p29_p0, %s28_s25), 0  ;;  %s2043_s26 = smov (!%p29_p0, %s31_s26), %s1578_s21 }
   0xe   : > { %2019 = sst [smem:[#allocation10_spill]] %s2041_s25  ;;  %s36_s28 = ssub.s32 %s1574_s20, %s2041_s25 }
   0xf   : > { %p1682_p3 = por %p48_p2, %p47_p1  ;;  %p33_p4 = scmp.ge.s32.totalorder %s2043_s26, 2 }
  0x10   : > { %p53_p5 = scmp.ne.s32.totalorder %s1558_s16, %s1554_s15  ;;  %p54_p6 = scmp.eq.s32.totalorder %s1265_s23, 0 }
  0x11   : > { %s108_s30 = sadd.s32 1, %s1550_s14  ;;  %s2045_s26 = smov (%p33_p4, %s2043_s26), 0 }
  0x12   : > { %2021 = sst [smem:[#allocation11_spill]] %s2045_s26  ;;  %p1690_p7 = por %p54_p6, %p53_p5 }
  0x13   : > { %p118_p8 = scmp.ne.s32.totalorder %s1550_s14, %s1546_s13  ;;  %s35_s5 = ssub.s32 %s1578_s21, %s2045_s26 }
  0x14   : > { %p119_p9 = scmp.eq.s32.totalorder %s1265_s23, 3  ;;  %s37_s6 = sor.u32 %s36_s28, %s35_s5 }
  0x15   : > { %p106_p10 = scmp.eq.s32.totalorder %s35_s5, 0  ;;  %p38_p11 = scmp.eq.s32.totalorder %s37_s6, 0 }
  0x16   : > { %p1698_p12 = por %p119_p9, %p118_p8  ;;  %p124_p13 = scmp.ne.s32.totalorder %s1546_s13, %s1542_s12 }
  0x17   : > { %s1703_s8 = scalar_select %p106_p10, %s1550_s14, %s108_s30  }
  0x18   : > { %s2023_s7 = scalar_select %p1698_p12, 1, 0 }
  0x19   : > { %s1706_s9 = scalar_select %p38_p11, %s1562_s17, %s40_s27  }
  0x1a   : > { %p125_p0 = scmp.eq.s32.totalorder %s1266_s24, 3  ;;  %p1324_p1 = scmp.lt.s32.totalorder %s1582_s22, 4 }
  0x1b   : > { %s151_s11 = sand.u32 1, %s1562_s17   ;;  %s1270_s23 = sshll.u32 %s1578_s21, 3 }
  0x1c   : > { %p1711_p2 = por %p125_p0, %p124_p13  ;;  %s1269_s15 = sshll.u32 %s151_s11, 5 }
  0x1d   : > { %s160_s28 = sadd.s32 %s1574_s20, %s1270_s23  ;;  %s155_s5 = scalar_lea.vmem [#allocation4], %s1269_s15 }
  0x1e   : > { %s2024_s10 = scalar_select %p1711_p2, 1, 0 }
  0x1f   : > { %s163_s6 = sshll.u32 %s155_s5, 4  ;;  %s1271_s26 = sshll.u32 %s160_s28, 7  ;;  %s1718_s6 = int_to_ptr.vmem [resolvable:$true] %s163_s6 }
  0x20   : > { %s1723_s27 = scalar_lea.hbm %s2012_s0, %s1271_s26  ;;  %p1727_p4 = pnand %p1324_p1, %p1682_p3 }
  0x21   : > { %s1731_s15 = scalar_lea.sflag [#allocation5], %s151_s11  ;;  %s1430_s23 = scalar_lea.hbm %s1723_s27, 512 }
  0x22   : > { %p1431_p5 = scmp.ne.s32.totalorder %s1723_s27, %s1430_s23  ;;  %p1432_p6 = pneg %p1727_p4 }
  0x23   : > { %s1435_s29 = scalar_lea.hbm %s2012_s0, 2048  ;;  %p1436_p3 = scmp.lt.u32.totalorder %s1723_s27, %s2012_s0 }
  0x24   : > { %p1433_p8 = pnand %p1432_p6, %p1431_p5  ;;  %p1437_p10 = scmp.lt.u32.totalorder %s1435_s29, %s1430_s23 }
  0x25   : > { %p1439_p13 = scmp.lt.u32.totalorder %s1430_s23, %s1723_s27 }
  0x26   : > { %p1434_p9 = pneg %p1433_p8  ;;  %p1438_p11 = por %p1437_p10, %p1436_p3 }
  0x28   : > { %p1440_p0 = por %p1439_p13, %p1438_p11 }
  0x2a   : > { %p1441_p1 = pnand %p1440_p0, %p1434_p9 }
  0x2c   : > { %1444 = shalt.err (!%p1441_p1)
}
  0x2d   : > { %s1445_s11 = scalar_lea.vmem %s1718_s6, 512  ;;  %s1584_s30 = smov [#allocation4]  }
  0x2e   : > { %p1446_p5 = scmp.ne.s32.totalorder %s1718_s6, %s1445_s11  ;;  %s1450_s25 = sshll.u32 %s1584_s30, 4  ;;  %s1451_s25 = int_to_ptr.vmem [resolvable:$false] %s1450_s25 }
  0x2f   : > { %s1452_s26 = scalar_lea.vmem %s1451_s25, 1024  ;;  %p1453_p12 = scmp.lt.s32.totalorder %s1718_s6, %s1451_s25 }
  0x30   : > { %p1448_p8 = pnand %p1446_p5, %p1432_p6  ;;  %p1454_p3 = scmp.lt.s32.totalorder %s1452_s26, %s1445_s11 }
  0x32   : > { %p1449_p2 = pneg %p1448_p8  ;;  %p1455_p10 = por %p1454_p3, %p1453_p12 }
  0x34   : > { %p1456_p11 = pnand %p1455_p10, %p1449_p2 }
  0x36   : > { %1459 = shalt.err (!%p1456_p11)
}
  0x37   : > { %s1585_s23 = smov 256   ;;  %s1586_s29 = smov 128  }
  0x38   : > { %s1587_s28 = smov 8   ;;  %p1272_p6 = scmp.ge.s32.totalorder %s1582_s22, 1 }
  0x39   : > { %1319 = dma.hbm_to_vmem [thread:$0]  (!%p1727_p4), %s1723_s27, 512, %s1718_s6, %s1731_s15, %s1585_s23, %s1586_s29, %s1587_s28  }
  0x3a   : > { %p171_p9 = scmp.lt.s32.totalorder %s1582_s22, 5 }
  0x3c   : > { %p172_p13 = pnand %p1272_p6, %p171_p9 }
  0x3d   : > { %s177_s5 = sand.u32 (!%p172_p13), 1, %s1558_s16  }
  0x3e   : > { %175 = sbr.rel (%p172_p13) target bundleno = 899 (0x383), region = 32  ;;  %s1273_s11 = sshll.u32 (!%p172_p13), %s177_s5, 5 }
  0x3f   : > { %s178_s30 = scalar_lea.sflag (!%p172_p13), [#allocation5], %s177_s5  ;;  %s181_s25 = scalar_lea.vmem (!%p172_p13), [#allocation4], %s1273_s11 }
  0x45   : > { %1533 = dma.done.wait (%p1690_p7), %s178_s30, 512  }
  0x46   : > { %1535 = vsyncadd (%p1690_p7), %s178_s30, 4294966784  ;;  %s201_s26 = sand.u32 1, %s1546_s13   ;;  %p1274_p12 = scmp.ne.s32.totalorder %s1566_s18, 0 }
  0x47   : > { %s1769_s6 = scalar_lea.vmem [#allocation7], %s201_s26  ;;  %vm207_vm0 = vcmask (!%p1274_p12), 253952   ;;  %v1588_v0 = vmov (!%p1274_p12), 0.0   ;;  %v1589_v1 = vmov (!%p1274_p12), -inf  }
  0x48   : > { %206 = sbr.rel (%p1274_p12) target bundleno = 79 (0x4f), region = 40  ;;  %208 = vst.msk [vmem:[#allocation2] sm:$0x1] (!%p1274_p12), %vm207_vm0, %v1588_v0  ;;  %209 = vst.msk [vmem:[#allocation3] sm:$0x1] (!%p1274_p12), %vm207_vm0, %v1589_v1 }
  0x4f PF: > { %v210_v2 = vld [vmem:[%s181_s25] sm:$0xff]  ;;  %v211_v3 = vld [vmem:[%s181_s25 + $0x8] sm:$0xff]  ;;  %v212_v4 = vld [vmem:[%s181_s25 + $0x10] sm:$0xff]  ;;  %v1590_v6 = vmov 0   ;;  %v227_v7 = vlaneseq  ;;  %v1591_v8 = vmov 1966171168  }
  0x50   : > { %215 = vadd.xlane.f32.xlu0 %v210_v2  ;;  %609 = vmax.xlane.f32.xlu1 %v210_v2  ;;  %v213_v5 = vld [vmem:[%s181_s25 + $0x18] sm:$0xff]  ;;  %v360_v9 = vunpack.c.l.s4 %v1591_v8  ;;  %vm574_vm1 = vcmask 130112   ;;  %vm581_vm2 = vcmask 195712   ;;  %vm588_vm3 = vcmask 261312   ;;  %p1275_p7 = scmp.ne.s32.totalorder %s1566_s18, 1 }
  0x51   : > { %1424 = vset.pattern.permute.xlu0 %v1590_v6  ;;  %1425 = vset.pattern.permute.xlu1 %v1590_v6  ;;  %v1773_v10 = vshrl.u32 %v227_v7, 7  ;;  %vm606_vm4 = vcmask 253952   ;;  %vm1593_vm5 = vmmov (!%p1275_p7), 0   ;;  %vm1006_vm6 = vcmask (!%p1275_p7), 1040384  }
  0x52   : > { %v361_v11 = vunpack.c.0.s8 %v360_v9  ;;  %vm1012_vm7 = vcmask (!%p1275_p7), 261120   ;;  %vm1088_vm8 = vcmask (!%p1275_p7), 64512  }
  0x53   : > { %v1776_v12 = vsub.s32 0, %v1773_v10  ;;  %v1779_v13 = vsub.s32 1, %v1773_v10  ;;  %v1782_v14 = vsub.s32 2, %v1773_v10  ;;  %v1785_v15 = vsub.s32 3, %v1773_v10 }
  0x54   : > { %217 = vadd.xlane.f32.xlu0 %v211_v3  ;;  %611 = vmax.xlane.f32.xlu1 %v211_v3  ;;  %v1788_v16 = vsub.s32 4, %v1773_v10  ;;  %v1791_v17 = vsub.s32 5, %v1773_v10  ;;  %v1794_v18 = vsub.s32 6, %v1773_v10  ;;  %v1797_v19 = vsub.s32 7, %v1773_v10 }
  0x55   : > { %v1800_v22 = vsub.s32 %v361_v11, %v1773_v10 }
  0x58   : > { %219 = vadd.xlane.f32.xlu0 %v212_v4  ;;  %613 = vmax.xlane.f32.xlu1 %v212_v4 }
  0x5c   : > { %221 = vadd.xlane.f32.xlu0 %v213_v5  ;;  %615 = vmax.xlane.f32.xlu1 %v213_v5 }
  0xdd   : > { %v216_v20 = vpop.xlane.xlu0 %215  ;;  %v610_v21 = vpop.xlane.xlu1 %609 }
  0xde   : > { %v230_v23 = vrot.slane %v216_v20, %v1776_v12  ;;  %v234_v24 = vrot.slane %v216_v20, %v1779_v13  ;;  %v238_v25 = vrot.slane %v216_v20, %v1782_v14  ;;  %v242_v26 = vrot.slane %v216_v20, %v1785_v15 }
  0xdf   : > { %v246_v27 = vrot.slane %v216_v20, %v1788_v16  ;;  %v250_v28 = vrot.slane %v216_v20, %v1791_v17  ;;  %v254_v29 = vrot.slane %v216_v20, %v1794_v18  ;;  %v258_v30 = vrot.slane %v216_v20, %v1797_v19 }
  0xe0   : > { %v355_v31 = vcombine.low %v230_v23, %v234_v24  ;;  %v356_v32 = vcombine.low %v238_v25, %v242_v26  ;;  %v624_v33 = vrot.slane %v610_v21, %v1776_v12  ;;  %v628_v34 = vrot.slane %v610_v21, %v1779_v13 }
  0xe1   : > { %v218_v35 = vpop.xlane.xlu0 %217  ;;  %v357_v36 = vcombine.low %v246_v27, %v250_v28  ;;  %v358_v37 = vcombine.low %v254_v29, %v258_v30  ;;  %v632_v38 = vrot.slane %v610_v21, %v1782_v14  ;;  %v636_v39 = vrot.slane %v610_v21, %v1785_v15  ;;  %v612_v60 = vpop.xlane.xlu1 %611 }
  0xe2   : > { %v365_v40 = vrot.slane %v355_v31, %v1800_v22  ;;  %v372_v41 = vrot.slane %v356_v32, %v1800_v22  ;;  %v262_v42 = vrot.slane %v218_v35, %v1776_v12  ;;  %v266_v43 = vrot.slane %v218_v35, %v1779_v13 }
  0xe3   : > { %v379_v44 = vrot.slane %v357_v36, %v1800_v22  ;;  %v386_v45 = vrot.slane %v358_v37, %v1800_v22  ;;  %v270_v46 = vrot.slane %v218_v35, %v1782_v14  ;;  %v274_v47 = vrot.slane %v218_v35, %v1785_v15 }
  0xe4   : > { %v387_v48 = vcombine.low %v365_v40, %v372_v41  ;;  %v278_v49 = vrot.slane %v218_v35, %v1788_v16  ;;  %v282_v50 = vrot.slane %v218_v35, %v1791_v17  ;;  %v286_v51 = vrot.slane %v218_v35, %v1794_v18 }
  0xe5   : > { %v388_v52 = vcombine.low %v379_v44, %v386_v45  ;;  %v290_v53 = vrot.slane %v218_v35, %v1797_v19  ;;  %v404_v54 = vcombine.low %v262_v42, %v266_v43  ;;  %v405_v55 = vcombine.low %v270_v46, %v274_v47  ;;  %v220_v32 = vpop.xlane.xlu0 %219 }
  0xe6   : > { %v395_v56 = vrot.slane %v387_v48, %v1800_v22  ;;  %v406_v57 = vcombine.low %v278_v49, %v282_v50  ;;  %v640_v58 = vrot.slane %v610_v21, %v1788_v16  ;;  %v644_v59 = vrot.slane %v610_v21, %v1791_v17  ;;  %v614_v49 = vpop.xlane.xlu1 %613 }
  0xe7   : > { %v402_v61 = vrot.slane %v388_v52, %v1800_v22  ;;  %v407_v62 = vcombine.low %v286_v51, %v290_v53  ;;  %v414_v63 = vrot.slane %v404_v54, %v1800_v22  ;;  %v421_v0 = vrot.slane %v405_v55, %v1800_v22 }
  0xe8   : > { %v428_v1 = vrot.slane %v406_v57, %v1800_v22  ;;  %v648_v2 = vrot.slane %v610_v21, %v1794_v18  ;;  %v652_v3 = vrot.slane %v610_v21, %v1797_v19  ;;  %v749_v4 = vcombine.low %v624_v33, %v628_v34 }
  0xe9   : > { %v403_v5 = vcombine.low %v395_v56, %v402_v61  ;;  %v435_v6 = vrot.slane %v407_v62, %v1800_v22  ;;  %v436_v8 = vcombine.low %v414_v63, %v421_v0  ;;  %v750_v9 = vcombine.low %v632_v38, %v636_v39 }
  0xea   : > { %v751_v11 = vcombine.low %v640_v58, %v644_v59  ;;  %v752_v20 = vcombine.low %v648_v2, %v652_v3  ;;  %v759_v23 = vrot.slane %v749_v4, %v1800_v22  ;;  %v656_v24 = vrot.slane %v612_v60, %v1776_v12 }
  0xeb   : > { %552 = vperm.xlu0 %1424, %v403_v5   ;;  %v437_v25 = vcombine.low %v428_v1, %v435_v6  ;;  %v444_v26 = vrot.slane %v436_v8, %v1800_v22  ;;  %v766_v27 = vrot.slane %v750_v9, %v1800_v22  ;;  %v660_v21 = vrot.slane %v612_v60, %v1779_v13 }
  0xec   : > { %v773_v28 = vrot.slane %v751_v11, %v1800_v22  ;;  %v780_v29 = vrot.slane %v752_v20, %v1800_v22  ;;  %v664_v30 = vrot.slane %v612_v60, %v1782_v14  ;;  %v668_v31 = vrot.slane %v612_v60, %v1785_v15  ;;  %v222_v20 = vpop.xlane.xlu0 %221 }
  0xed   : > { %v451_v33 = vrot.slane %v437_v25, %v1800_v22  ;;  %v781_v34 = vcombine.low %v759_v23, %v766_v27  ;;  %v672_v35 = vrot.slane %v612_v60, %v1788_v16  ;;  %v676_v36 = vrot.slane %v612_v60, %v1791_v17 }
  0xee   : > { %v782_v37 = vcombine.low %v773_v28, %v780_v29  ;;  %v680_v38 = vrot.slane %v612_v60, %v1794_v18  ;;  %v684_v39 = vrot.slane %v612_v60, %v1797_v19  ;;  %v798_v40 = vcombine.low %v656_v24, %v660_v21 }
  0xef   : > { %v452_v41 = vcombine.low %v444_v26, %v451_v33  ;;  %v789_v42 = vrot.slane %v781_v34, %v1800_v22  ;;  %v799_v43 = vcombine.low %v664_v30, %v668_v31  ;;  %v800_v44 = vcombine.low %v672_v35, %v676_v36 }
  0xf0   : > { %v796_v45 = vrot.slane %v782_v37, %v1800_v22  ;;  %v801_v46 = vcombine.low %v680_v38, %v684_v39  ;;  %v808_v47 = vrot.slane %v798_v40, %v1800_v22  ;;  %v294_v48 = vrot.slane %v220_v32, %v1776_v12 }
  0xf1   : > { %555 = vperm.xlu1 %1425, %v452_v41   ;;  %v815_v50 = vrot.slane %v799_v43, %v1800_v22  ;;  %v822_v51 = vrot.slane %v800_v44, %v1800_v22  ;;  %v298_v52 = vrot.slane %v220_v32, %v1779_v13  ;;  %v302_v53 = vrot.slane %v220_v32, %v1782_v14 }
  0xf2   : > { %v797_v54 = vcombine.low %v789_v42, %v796_v45  ;;  %v829_v55 = vrot.slane %v801_v46, %v1800_v22  ;;  %v306_v56 = vrot.slane %v220_v32, %v1785_v15  ;;  %v310_v57 = vrot.slane %v220_v32, %v1788_v16  ;;  %v616_v42 = vpop.xlane.xlu1 %615 }
  0xf3   : > { %v830_v58 = vcombine.low %v808_v47, %v815_v50  ;;  %v314_v59 = vrot.slane %v220_v32, %v1791_v17  ;;  %v318_v60 = vrot.slane %v220_v32, %v1794_v18  ;;  %v322_v61 = vrot.slane %v220_v32, %v1797_v19 }
  0xf4   : > { %v831_v62 = vcombine.low %v822_v51, %v829_v55  ;;  %v453_v63 = vcombine.low %v294_v48, %v298_v52  ;;  %v454_v0 = vcombine.low %v302_v53, %v306_v56  ;;  %v688_v1 = vrot.slane %v614_v49, %v1776_v12 }
  0xf5   : > { %946 = vperm.xlu1 %1425, %v797_v54   ;;  %v838_v2 = vrot.slane %v830_v58, %v1800_v22  ;;  %v455_v3 = vcombine.low %v310_v57, %v314_v59  ;;  %v456_v4 = vcombine.low %v318_v60, %v322_v61  ;;  %v692_v5 = vrot.slane %v614_v49, %v1779_v13 }
  0xf6   : > { %v845_v6 = vrot.slane %v831_v62, %v1800_v22  ;;  %v463_v8 = vrot.slane %v453_v63, %v1800_v22  ;;  %v470_v9 = vrot.slane %v454_v0, %v1800_v22  ;;  %v696_v11 = vrot.slane %v614_v49, %v1782_v14 }
  0xf7   : > { %v477_v23 = vrot.slane %v455_v3, %v1800_v22  ;;  %v484_v24 = vrot.slane %v456_v4, %v1800_v22  ;;  %v700_v25 = vrot.slane %v614_v49, %v1785_v15  ;;  %v704_v26 = vrot.slane %v614_v49, %v1788_v16 }
  0xf8   : > { %v846_v27 = vcombine.low %v838_v2, %v845_v6  ;;  %v485_v21 = vcombine.low %v463_v8, %v470_v9  ;;  %v708_v28 = vrot.slane %v614_v49, %v1791_v17  ;;  %v712_v29 = vrot.slane %v614_v49, %v1794_v18 }
  0xf9   : > { %v486_v30 = vcombine.low %v477_v23, %v484_v24  ;;  %v716_v31 = vrot.slane %v614_v49, %v1797_v19  ;;  %v847_v32 = vcombine.low %v688_v1, %v692_v5  ;;  %v848_v33 = vcombine.low %v696_v11, %v700_v25 }
  0xfa   : > { %949 = vperm.xlu1 %1425, %v846_v27   ;;  %v493_v34 = vrot.slane %v485_v21, %v1800_v22  ;;  %v849_v35 = vcombine.low %v704_v26, %v708_v28  ;;  %v326_v36 = vrot.slane %v222_v20, %v1776_v12  ;;  %v330_v37 = vrot.slane %v222_v20, %v1779_v13 }
  0xfb   : > { %v500_v38 = vrot.slane %v486_v30, %v1800_v22  ;;  %v850_v39 = vcombine.low %v712_v29, %v716_v31  ;;  %v857_v40 = vrot.slane %v847_v32, %v1800_v22  ;;  %v864_v41 = vrot.slane %v848_v33, %v1800_v22 }
  0xfc   : > { %v871_v43 = vrot.slane %v849_v35, %v1800_v22  ;;  %v334_v44 = vrot.slane %v222_v20, %v1782_v14  ;;  %v338_v45 = vrot.slane %v222_v20, %v1785_v15  ;;  %v342_v46 = vrot.slane %v222_v20, %v1788_v16 }
  0xfd   : > { %v501_v47 = vcombine.low %v493_v34, %v500_v38  ;;  %v878_v48 = vrot.slane %v850_v39, %v1800_v22  ;;  %v879_v49 = vcombine.low %v857_v40, %v864_v41  ;;  %v346_v50 = vrot.slane %v222_v20, %v1791_v17 }
  0xfe   : > { %v350_v51 = vrot.slane %v222_v20, %v1794_v18  ;;  %v354_v52 = vrot.slane %v222_v20, %v1797_v19  ;;  %v502_v53 = vcombine.low %v326_v36, %v330_v37  ;;  %v503_v54 = vcombine.low %v334_v44, %v338_v45 }
  0xff   : > { %558 = vperm.xlu1 %1425, %v501_v47   ;;  %v880_v55 = vcombine.low %v871_v43, %v878_v48  ;;  %v887_v56 = vrot.slane %v879_v49, %v1800_v22  ;;  %v504_v57 = vcombine.low %v342_v46, %v346_v50  ;;  %v720_v58 = vrot.slane %v616_v42, %v1776_v12 }
 0x100   : > { %v505_v59 = vcombine.low %v350_v51, %v354_v52  ;;  %v512_v60 = vrot.slane %v502_v53, %v1800_v22  ;;  %v519_v61 = vrot.slane %v503_v54, %v1800_v22  ;;  %v724_v62 = vrot.slane %v616_v42, %v1779_v13 }
 0x101   : > { %v894_v63 = vrot.slane %v880_v55, %v1800_v22  ;;  %v526_v0 = vrot.slane %v504_v57, %v1800_v22  ;;  %v728_v1 = vrot.slane %v616_v42, %v1782_v14  ;;  %v732_v2 = vrot.slane %v616_v42, %v1785_v15  ;;  %v214_v55 = vld [vmem:[#allocation2] sm:$0x1] }
 0x102   : > { %v533_v3 = vrot.slane %v505_v59, %v1800_v22  ;;  %v534_v4 = vcombine.low %v512_v60, %v519_v61  ;;  %v736_v12 = vrot.slane %v616_v42, %v1788_v16  ;;  %v740_v5 = vrot.slane %v616_v42, %v1791_v17 }
 0x103   : > { %v895_v6 = vcombine.low %v887_v56, %v894_v63  ;;  %v744_v8 = vrot.slane %v616_v42, %v1794_v18  ;;  %v748_v13 = vrot.slane %v616_v42, %v1797_v19  ;;  %v896_v9 = vcombine.low %v720_v58, %v724_v62  ;;  %v608_v63 = vld [vmem:[#allocation3] sm:$0x1] }
 0x104   : > { %v535_v11 = vcombine.low %v526_v0, %v533_v3  ;;  %v542_v20 = vrot.slane %v534_v4, %v1800_v22  ;;  %v897_v23 = vcombine.low %v728_v1, %v732_v2  ;;  %v898_v14 = vcombine.low %v736_v12, %v740_v5  ;;  %v1008_v2 = vld [vmem:[%s2013_s1] sm:$0xff] (!%p1275_p7)  ;;  %v1009_v3 = vld [vmem:[%s2013_s1 + $0x8] sm:$0xff] (!%p1275_p7)  ;;  %v1010_v4 = vld [vmem:[%s2013_s1 + $0x10] sm:$0xff] (!%p1275_p7) }
 0x105   : > { %952 = vperm.xlu1 %1425, %v895_v6   ;;  %v899_v15 = vcombine.low %v744_v8, %v748_v13  ;;  %v906_v24 = vrot.slane %v896_v9, %v1800_v22  ;;  %v564_v33 = vand.u32 127, %v227_v7  ;;  %v1592_v12 = vmov (!%p1275_p7), 0.0|0.0   ;;  %v1011_v5 = vld [vmem:[%s2013_s1 + $0x18] sm:$0xff] (!%p1275_p7) }
 0x106   : > { %v549_v25 = vrot.slane %v535_v11, %v1800_v22  ;;  %v913_v16 = vrot.slane %v897_v23, %v1800_v22  ;;  %v920_v17 = vrot.slane %v898_v14, %v1800_v22  ;;  %1306 = vmatprep.subr.bf16.mxu0 (!%p1275_p7), %v1592_v12  ;;  %v1594_v6 = vmov (!%p1275_p7), 0.0   ;;  %v1087_v23 = vld [vmem:[%s2014_s2] sm:$0xff] (!%p1275_p7) }
 0x107   : > { %v927_v18 = vrot.slane %v899_v15, %v1800_v22  ;;  %v569_v34 = vadd.s32 4294967288, %v564_v33  ;;  %v576_v36 = vadd.s32 4294967280, %v564_v33  ;;  %v583_v38 = vadd.s32 4294967272, %v564_v33  ;;  %1298 = vmatprep.mubr.msk.f32.mxu0 (!%p1275_p7), %vm1593_vm5, %v1594_v6  ;;  %1301 = vmatprep.subr.mxu1 (!%p1275_p7), %v1594_v6 }
 0x108   : > { %v550_v26 = vcombine.low %v542_v20, %v549_v25  ;;  %v928_v19 = vcombine.low %v906_v24, %v913_v16  ;;  %v567_v40 = vsub.s32 %v564_v33, %v1773_v10  ;;  %1303 = vmatprep.mubr.msk.f32.mxu1 (!%p1275_p7), %vm1593_vm5, %v1594_v6  ;;  %v1310_v13 = vpack.c.bf16 (!%p1275_p7), %v1011_v5, %v1010_v4 }
 0x109   : > { %v929_v27 = vcombine.low %v920_v17, %v927_v18  ;;  %v572_v37 = vsub.s32 %v569_v34, %v1773_v10  ;;  %v579_v39 = vsub.s32 %v576_v36, %v1773_v10  ;;  %v586_v44 = vsub.s32 %v583_v38, %v1773_v10  ;;  %1302 = vmatpush3.msra.mxu1 (!%p1275_p7), %v1087_v23 }
 0x10a   : > { %561 = vperm.xlu1 %1425, %v550_v26   ;;  %v936_v21 = vrot.slane %v928_v19, %v1800_v22 }
 0x10b   : > { %v943_v28 = vrot.slane %v929_v27, %v1800_v22 }
 0x10d   : > { %v944_v29 = vcombine.low %v936_v21, %v943_v28 }
 0x10f   : > { %955 = vperm.xlu1 %1425, %v944_v29  }
 0x16a   : > { %v553_v42 = vpop.permute.xlu0 %552 }
 0x16b   : > { %v568_v46 = vrot.slane %v553_v42, %v567_v40 }
 0x170   : > { %v556_v30 = vpop.permute.xlu1 %555 }
 0x171   : > { %v573_v43 = vrot.slane %v556_v30, %v572_v37 }
 0x173   : > { %v575_v47 = vsel %vm574_vm1, %v573_v43, %v568_v46 }
 0x174   : > { %v947_v31 = vpop.permute.xlu1 %946 }
 0x175   : > { %v960_v53 = vrot.slane %v947_v31, %v567_v40 }
 0x179   : > { %v950_v32 = vpop.permute.xlu1 %949 }
 0x17a   : > { %v964_v49 = vrot.slane %v950_v32, %v572_v37 }
 0x17c   : > { %v965_v56 = vsel %vm574_vm1, %v964_v49, %v960_v53 }
 0x17e   : > { %v559_v35 = vpop.permute.xlu1 %558 }
 0x17f   : > { %v580_v45 = vrot.slane %v559_v35, %v579_v39 }
 0x181   : > { %v582_v50 = vsel %vm581_vm2, %v580_v45, %v575_v47 }
 0x184   : > { %v953_v41 = vpop.permute.xlu1 %952 }
 0x185   : > { %v969_v51 = vrot.slane %v953_v41, %v579_v39 }
 0x187   : > { %v970_v59 = vsel %vm581_vm2, %v969_v51, %v965_v56 }
 0x189   : > { %v562_v7 = vpop.permute.xlu1 %561 }
 0x18a   : > { %v587_v48 = vrot.slane %v562_v7, %v586_v44 }
 0x18c   : > { %v589_v52 = vsel %vm588_vm3, %v587_v48, %v582_v50 }
 0x18d   : > { %v596_v54 = vrot.slane %v589_v52, %v1800_v22 }
 0x18e   : > { %v956_v10 = vpop.permute.xlu1 %955 }
 0x18f   : > { %v603_v57 = vrot.slane %v596_v54, %v1800_v22  ;;  %v974_v58 = vrot.slane %v956_v10, %v586_v44 }
 0x191   : > { %v605_v60 = vadd.f32 %v603_v57, %v214_v55  ;;  %v975_v61 = vsel %vm588_vm3, %v974_v58, %v970_v59 }
 0x192   : > { %v982_v62 = vrot.slane %v975_v61, %v1800_v22  ;;  %996 = sbr.rel (%p1275_p7) target bundleno = 874 (0x36a), region = 44 }
 0x193   : > { %607 = vst.msk [vmem:[#allocation2] sm:$0x1] %vm606_vm4, %v605_v60 }
 0x194   : > { %v989_v0 = vrot.slane %v982_v62, %v1800_v22  ;;  %v1307_v22 = vpack.c.bf16 (!%p1275_p7), %v1009_v3, %v1008_v2 }
 0x196   : > { %v991_v1 = vmax.f32 %v608_v63, %v989_v0  ;;  %1308 = vmatpush3.bf16.msra.mxu0 (!%p1275_p7), %v1307_v22 }
 0x197   : > { %1309 = vmatprep.subr.bf16.mxu0 (!%p1275_p7), %v1592_v12 }
 0x198   : > { %992 = vst.msk [vmem:[#allocation3] sm:$0x1] %vm606_vm4, %v991_v1 }
 0x19a   : > { %v997_v8 = vld [vmem:[#allocation2] sm:$0x1]  ;;  %1311 = vmatpush3.bf16.msra.mxu0 %v1310_v13 }
 0x19b   : > { %v998_v9 = vmul.f32 0.00390625, %v997_v8 }
 0x19f   : > { %v1276_v11 = vld [vmem:[#allocation3] ss:$0 sm:$0xff] }
 0x1a0   : > { %v1007_v20 = vsel %vm1006_vm6, %v998_v9, %v1276_v11 }
 0x1a1   : > { %1299 = vmatmul.mubr.msk.f32.vlgmr.msra.gmra.mrb[0].mxu0 %vm1012_vm7, %v1007_v20 }
 0x274   : > { %v1082_v14 = vpop.f32.mrb[0].mxu0 }
 0x275   : > { %v1086_v15 = vmax.f32 %v1082_v14, 0.0  ;;  %v1300_v24 = vpop.f32.mrb[1].mxu0 }
 0x277   : > { %1304 = vmatmul.mubr.msk.f32.vlgmr.msra.gmra.mrb[0].mxu1 %vm1088_vm8, %v1086_v15 }
 0x34a   : > { %v1158_v25 = vpop.f32.mrb[0].mxu1 }
 0x34b   : > { %v1163_v16 = vrot.slane %v1158_v25, 1  ;;  %v1305_v17 = vpop.f32.mrb[1].mxu1 }
 0x34d   : > { %v1165_v18 = vadd.f32 %v1163_v16, %v1158_v25 }
 0x34f   : > { %v1279_v26 = vmul.f32 -1.442695, %v1165_v18 }
 0x351   : > { %1426 = vpow2.f32 %v1279_v26 }
 0x35b   : > { %v1427_v19 = vpop.eup %1426 }
 0x35c   : > { %v1169_v27 = vadd.f32 1.0, %v1427_v19 }
 0x35e   : > { %1428 = vrcp.f32 %v1169_v27 }
 0x368   : > { %v1429_v21 = vpop.eup %1428 }
 0x369   : > { %1172 = vst.msk [vmem:[%s1769_s6] sm:$0x1] %vm606_vm4, %v1429_v21 }
 0x36a PF: > { %s1280_s30 = sshll.u32 %s1570_s19, 4  ;;  %s1186_s24 = sshll.u32 %s1769_s6, 4  ;;  %s1187_s24 = int_to_ptr.vmem [resolvable:$true] %s1186_s24 }
 0x36b   : > { %s1953_s27 = scalar_lea.hbm %s2015_s3, %s1280_s30  ;;  %s1174_s15 = scalar_lea.sflag [#allocation6], %s201_s26 }
 0x36c   : > { %s1460_s23 = scalar_lea.vmem %s1187_s24, 16  ;;  %p2026_p4 = scmp.ne.s32.totalorder %s2023_s7, 0 }
 0x36d   : > { %p1461_p2 = scmp.ne.s32.totalorder %s1187_s24, %s1460_s23  ;;  %s1595_s29 = smov [#allocation7]  }
 0x36e   : > { %s1464_s28 = sshll.u32 %s1595_s29, 4  ;;  %s1465_s28 = int_to_ptr.vmem [resolvable:$false] %s1464_s28 }
 0x36f   : > { %p1462_p0 = pnand %p1461_p2, %p2026_p4  ;;  %s1466_s5 = scalar_lea.vmem %s1465_s28, 32 }
 0x370   : > { %p1467_p5 = scmp.lt.s32.totalorder %s1187_s24, %s1465_s28  ;;  %p1468_p8 = scmp.lt.s32.totalorder %s1466_s5, %s1460_s23 }
 0x371   : > { %p1463_p1 = pneg %p1462_p0 }
 0x372   : > { %p1469_p3 = por %p1468_p8, %p1467_p5 }
 0x374   : > { %p1470_p10 = pnand %p1469_p3, %p1463_p1 }
 0x376   : > { %1473 = shalt.err (!%p1470_p10)
}
 0x377   : > { %s1474_s19 = scalar_lea.hbm %s1953_s27, 16  ;;  %s1478_s18 = scalar_lea.hbm %s2015_s3, 32 }
 0x378   : > { %p1475_p11 = scmp.ne.s32.totalorder %s1953_s27, %s1474_s19  ;;  %p1479_p13 = scmp.lt.u32.totalorder %s1953_s27, %s2015_s3 }
 0x379   : > { %p1480_p12 = scmp.lt.u32.totalorder %s1478_s18, %s1474_s19  ;;  %p1482_p2 = scmp.lt.u32.totalorder %s1474_s19, %s1953_s27 }
 0x37a   : > { %p1476_p6 = pnand %p1475_p11, %p2026_p4 }
 0x37b   : > { %p1481_p7 = por %p1480_p12, %p1479_p13 }
 0x37c   : > { %p1477_p9 = pneg %p1476_p6 }
 0x37d   : > { %p1483_p0 = por %p1482_p2, %p1481_p7 }
 0x37f   : > { %p1484_p1 = pnand %p1483_p0, %p1477_p9 }
 0x381   : > { %1487 = shalt.err (!%p1484_p1)
}
 0x382   : > { %1314 = dma.vmem_to_hbm [thread:$0]  (%p2026_p4), %s1187_s24, 16, %s1953_s27, %s1174_s15  }
 0x383 PF: > { %p1325_p5 = scmp.ge.s32.totalorder %s1582_s22, 2  ;;  %s1198_s25 = sand.u32 1, %s1542_s12  }
 0x384   : > { %p2027_p8 = scmp.ne.s32.totalorder %s2024_s10, 0  ;;  %s1199_s4 = scalar_lea.sflag [#allocation6], %s1198_s25 }
 0x386   : > { %p1321_p3 = pnand %p1325_p5, %p2027_p8 }
 0x388   : > { %1537 = dma.done.wait (!%p1321_p3), %s1199_s4, 16  }
 0x389   : > { %1539 = vsyncadd (!%p1321_p3), %s1199_s4, 4294967280  ;;  %s19_s22 = sadd.s32 1, %s1582_s22   ;;  %s2028_s7 = sld [smem:[#allocation10_spill]] }
 0x38a   : > { %p16_p10 = scmp.ge.s32.totalorder %s19_s22, 6   ;;  %s2029_s27 = sld [smem:[#allocation11_spill]] }
 0x38b   : > { %s2030_s12 = smov %s1546_s13  ;;  %s2031_s13 = smov %s1550_s14 }
 0x38c   : > { %s2032_s14 = smov %s1703_s8  ;;  %s2033_s15 = smov %s1558_s16 }
 0x38d   : > { %s2034_s16 = smov %s1562_s17  ;;  %s2035_s17 = smov %s1706_s9 }
 0x38e   : > { %s2036_s18 = smov %s1574_s20  ;;  %s2037_s19 = smov %s1578_s21 }
 0x38f   : > { %s2038_s20 = smov %s2028_s7  ;;  %18 = sbr.rel (!%p16_p10) target bundleno = 9 (0x9), region = 85 }
 0x390   : > { %s2039_s21 = smov %s2029_s27 }
 0x396   :  { %1203 = vsyncpa [#allocation5], 1 }
 0x397   :  { %1205 = vsyncpa [#allocation5 + $0x1], 1 }
 0x398   :  { %1206 = vsyncpa [#allocation6], 1 }
 0x399   :  { %1208 = vsyncpa [#allocation6 + $0x1], 1 }

</bundles_post_ra>
